<compile_context>
chip_gen: v5e
topology: v5e:2x2
jax: 0.10.0
libtpu: 0.0.40
codegen_flags: <defaults>
</compile_context>

<pallas_src>
import jax
import jax.numpy as jnp
from jax.experimental import pallas as pl
from jax.experimental.pallas import tpu as pltpu


def _copy_slice_kernel(x_ref, o_ref):
    # Copy the leading o_ref.shape[-1] columns of the input block.  On the
    # column-tiled path both blocks have the same width so this is a straight
    # copy; on the full-width path the static slice drops the chomped tail.
    o_ref[...] = x_ref[:, : o_ref.shape[-1]]


def _sublane_pack(itemsize: int) -> int:
    # Minimum row-tile multiple so packed sub-32-bit rows stay unmasked:
    # f32 -> 8, bf16/f16 -> 16, int8/fp8 -> 32.
    return 8 * max(1, 4 // max(1, itemsize))


def _row_tile(rows: int, bytes_per_row: int, target: int, budget: int, pack: int) -> int:
    """Row tile: the full `rows` if small, else a pack-aligned tile capped by
    `target` and by the VMEM budget (bytes_per_row already accounts for the
    double-buffered input + output slabs)."""
    tr = min(target, rows)
    if bytes_per_row > 0:
        tr = min(tr, max(pack, budget // bytes_per_row))
    if tr >= rows:
        return rows
    return max(pack, (tr // pack) * pack)


def chomp1d(
    x: jax.Array,
    chomp_size: int,
    *,
    row_tile: int = 1024,
    col_tile: int = 1024,
    vmem_budget: int = 16 * 1024 * 1024,
) -> jax.Array:
    """Pallas equivalent of Chomp1d(chomp_size).forward(x) for x of shape (N, C, L)."""
    N, C, L = x.shape
    if chomp_size == 0:
        # PyTorch: x[:, :, :-0] == x[:, :, :0] -> empty along L; no kernel needed.
        return x[:, :, :0]
    assert 0 < chomp_size < L, "chomp_size must be in [0, L)"
    L_out = L - chomp_size

    rows = N * C
    x2 = x.reshape(rows, L)  # free metadata reshape (contiguous row-major)
    itemsize = x.dtype.itemsize
    pack = _sublane_pack(itemsize)

    # Full-width path: forced when L_out < 128 (blocks must equal the full last
    # dim to satisfy the (8,128) rule), preferred whenever the chomp overhead
    # is small and the sequence fits comfortably in one column span.
    use_full_width = (L_out < 128) or (chomp_size * 8 <= L and L <= 2 * col_tile)

    if use_full_width:
        in_w, out_w = L, L_out
        bytes_per_row = 2 * (in_w + out_w) * itemsize   # double-buffered in + out
        tr = _row_tile(rows, bytes_per_row, row_tile, vmem_budget, pack)
        row_steps = pl.cdiv(rows, tr)
        col_steps = 1
        tc = None
    else:
        # Balanced column tile: spread L_out as evenly as possible over the
        # needed number of tiles, rounded up to a 128 multiple, so the final
        # (masked) tile is not mostly empty.
        n_col = max(1, pl.cdiv(L_out, col_tile))
        per = pl.cdiv(L_out, n_col)
        tc = 128 * pl.cdiv(per, 128)
        if tc > L_out:  # avoid a single block wider than the dim; floor + edge tile
            tc = (L_out // 128) * 128
        in_w = out_w = tc
        bytes_per_row = 2 * (in_w + out_w) * itemsize
        tr = _row_tile(rows, bytes_per_row, row_tile, vmem_budget, pack)
        row_steps = pl.cdiv(rows, tr)
        col_steps = pl.cdiv(L_out, tc)

    # v7x has 2 TensorCores; a single-step grid pins everything on one core and
    # leaves half the HBM bandwidth idle.  Split the row tile if possible.
    if row_steps * col_steps < 2 and rows > pack:
        tr = max(pack, pack * ((rows // 2) // pack))
        row_steps = pl.cdiv(rows, tr)

    if use_full_width:
        grid = (row_steps,)
        in_spec = pl.BlockSpec((tr, L), lambda i: (i, 0))
        out_spec = pl.BlockSpec((tr, L_out), lambda i: (i, 0))
        dim_sem = ("parallel",)
    else:
        grid = (row_steps, col_steps)
        in_spec = pl.BlockSpec((tr, tc), lambda i, j: (i, j))
        out_spec = pl.BlockSpec((tr, tc), lambda i, j: (i, j))
        dim_sem = ("parallel", "parallel")

    # Tie scoped VMEM to the actual double-buffered footprint (+~25% headroom),
    # clamped so it stays valid on v5e/v6e (128 MiB) and v7x (64 MiB physical).
    footprint = 2 * tr * (in_w + out_w) * itemsize
    vmem_limit = int(min(48 * 1024 * 1024,
                         max(16 * 1024 * 1024,
                             footprint + footprint // 4 + (2 << 20))))

    out2 = pl.pallas_call(
        _copy_slice_kernel,
        out_shape=jax.ShapeDtypeStruct((rows, L_out), x.dtype),
        grid=grid,
        in_specs=[in_spec],
        out_specs=out_spec,
        compiler_params=pltpu.CompilerParams(
            dimension_semantics=dim_sem,
            vmem_limit_bytes=vmem_limit,
        ),
    )(x2)
    return out2.reshape(N, C, L_out)


if __name__ == "__main__":
    key = jax.random.PRNGKey(0)
    k0, k1, k2, k3, k4 = jax.random.split(key, 5)

    # Small shape matching the module's NCL layout (L_out < 128 -> full-width path).
    N, C, L = 2, 4, 16
    chomp_size = 3
    x = jax.random.normal(k0, (N, C, L), dtype=jnp.float32)
    out = jax.block_until_ready(chomp1d(x, chomp_size))
    ref = x[:, :, : L - chomp_size]
    assert out.shape == (N, C, L - chomp_size), out.shape
    assert out.dtype == x.dtype
    assert jnp.array_equal(out, ref), "mismatch vs. reference slice (small full-width path)"

    # Full-width path, lane-aligned output width (L_out = 256).
    xa = jax.random.normal(k1, (2, 4, 260), dtype=jnp.float32)
    outa = jax.block_until_ready(chomp1d(xa, 4))
    assert jnp.array_equal(outa, xa[:, :, :256]), "mismatch (full-width aligned path)"

    # Full-width path, unaligned output width (L_out = 593).
    xb = jax.random.normal(k2, (2, 4, 600), dtype=jnp.float32)
    outb = jax.block_until_ready(chomp1d(xb, 7))
    assert jnp.array_equal(outb, xb[:, :, :593]), "mismatch (full-width unaligned path)"

    # Column-tiled path (L > 2*col_tile) with balanced tiles + masked edge.
    xc = jax.random.normal(k3, (1, 2, 2300), dtype=jnp.float32)
    outc = jax.block_until_ready(chomp1d(xc, 12))
    assert jnp.array_equal(outc, xc[:, :, :2288]), "mismatch (column-tiled path)"

    # Column-tiled path with bf16 (exercises dtype-aware row-tile packing).
    xd = jax.random.normal(k4, (2, 16, 2176), dtype=jnp.float32).astype(jnp.bfloat16)
    outd = jax.block_until_ready(chomp1d(xd, 5))
    assert jnp.array_equal(outd, xd[:, :, :2171]), "mismatch (bf16 column-tiled path)"

    print("KERNEL_OK")
</pallas_src>

<mosaic_0001>
module attributes {stable_mosaic.version = 11 : i64} {
  func.func @_copy_slice_kernel(%arg0: i32, %arg1: memref<8x16xf32, #tpu.memory_space<vmem>>, %arg2: memref<8x13xf32, #tpu.memory_space<vmem>>) attributes {dimension_semantics = [#tpu.dimension_semantics<parallel>], iteration_bounds = array<i64: 1>, scalar_prefetch = 0 : i64, scratch_operands = 0 : i64, tpu.core_type = #tpu.core_type<tc>, window_params = [{transform_indices = @transform_0, window_bounds = array<i64: 8, 16>}, {transform_indices = @transform_1, window_bounds = array<i64: 8, 13>}]} {
    %c0 = arith.constant 0 : index
    %c0_0 = arith.constant 0 : index
    %0 = vector.load %arg1[%c0, %c0_0] : memref<8x16xf32, #tpu.memory_space<vmem>>, vector<8x13xf32>
    %c0_1 = arith.constant 0 : index
    %c0_2 = arith.constant 0 : index
    %1 = vector.load %arg2[%c0_1, %c0_2] : memref<8x13xf32, #tpu.memory_space<vmem>>, vector<8x13xf32>
    tpu.vector_store %arg2[%c0_1, %c0_2], %0 {strides = array<i32>} : memref<8x13xf32, #tpu.memory_space<vmem>>, vector<8x13xf32>,
    return
  }
  func.func @transform_0(%arg0: i32) -> (i32, i32) {
    %c0_i32 = arith.constant 0 : i32
    %c0_i32_0 = arith.constant 0 : i32
    return %arg0, %c0_i32 : i32, i32
  }
  func.func @transform_1(%arg0: i32) -> (i32, i32) {
    %c0_i32 = arith.constant 0 : i32
    %c0_i32_0 = arith.constant 0 : i32
    return %arg0, %c0_i32 : i32, i32
  }
}

</mosaic_0001>

<bundles_post_ra>
// kernel: tpu_custom_call.1
= control target key start
LH: loop header
LB: loop body
LE: loop exit
PB: predicated region body
PF: predicated region fallthrough
CT: control target
= control target key end

     0   :  { %6 = vsyncpa [#allocation3], 0  ;;  %s115_s0 = inlined_call_operand.hbm [shape: f32[8,16], index: 0, kind: input, shape index: {}]   ;;  %s116_s1 = inlined_call_operand.hbm [shape: f32[8,13], index: 1, kind: output, shape index: {}]  }
   0x1   :  { %7 = vsyncpa [#allocation4], 0  ;;  %s13_s8 = sshll.u32 %s115_s0, 4  ;;  %s97_s9 = smov [#allocation2]   ;;  %s14_s8 = int_to_ptr.hbm [resolvable:$true] %s13_s8 }
   0x2   :  { %s15_s10 = sshll.u32 %s97_s9, 4  ;;  %s16_s10 = int_to_ptr.vmem [resolvable:$true] %s15_s10 }
   0x3   :  { %18 = dma.hbm_to_vmem [thread:$0]  %s14_s8, 128, %s16_s10, [#allocation3]  }
   0x4   :  { %93 = dma.done.wait [#allocation3], 128  }
   0x5   :  { %94 = vsyncadd [#allocation3], 4294967168  ;;  %s98_s11 = smov [#allocation5]   ;;  %s33_s15 = sshll.u32 %s116_s1, 4  ;;  %vm24_vm0 = vcmask 105472   ;;  %v23_v0 = vld [vmem:[#allocation2] sm:$0xff]  ;;  %s34_s15 = int_to_ptr.hbm [resolvable:$true] %s33_s15 }
   0x6   :  { %s31_s12 = sshll.u32 %s98_s11, 4  ;;  %25 = vst.msk [vmem:[#allocation5] sm:$0xff] %vm24_vm0, %v23_v0  ;;  %s32_s12 = int_to_ptr.vmem [resolvable:$true] %s31_s12 }
   0x7   :  { %36 = dma.vmem_to_hbm [thread:$0]  %s32_s12, 128, %s34_s15, [#allocation4]  }
   0x8   :  { %95 = dma.done.wait [#allocation4], 128  }
   0x9   :  { %96 = vsyncadd [#allocation4], 4294967168 }
   0xa   :  { %41 = vsyncpa [#allocation3], 1 }
   0xb   :  { %42 = vsyncpa [#allocation4], 1 }

</bundles_post_ra>
